<compile_context>
chip_gen: v6e
topology: v6e:2x2x1
jax: 0.10.0
libtpu: 0.0.40
codegen_flags: <defaults>
</compile_context>

<pallas_src>
import math
import functools

import jax
import jax.numpy as jnp
from jax.experimental import pallas as pl
from jax.experimental.pallas import tpu as pltpu


def _round_up(v, m):
    return ((v + m - 1) // m) * m


def _sublane_min(dtype):
    itemsize = jnp.dtype(dtype).itemsize
    if itemsize >= 4:
        return 8
    if itemsize == 2:
        return 16
    return 32


def _vmem_limit_bytes():
    try:
        cap = int(pltpu.get_tpu_info().vmem_capacity_bytes)
    except Exception:
        cap = 64 * 1024 * 1024  # assume the smallest (v7x per-TC) when unknown
    return min((cap * 3) // 4, 96 * 1024 * 1024)


def _pick_tile(dim, target, align):
    """Largest tile <= target (multiple of `align`) keeping padding waste <~12%."""
    dim = max(int(dim), 1)
    min_pad = _round_up(dim, align)
    if min_pad <= target:
        return min_pad
    cand = target
    while cand > align:
        if _round_up(dim, cand) * 8 <= min_pad * 9:  # <= 12.5% over minimal padding
            return cand
        cand //= 2
    return align


# ---------------------------------------------------------------------------
# Kernels
# ---------------------------------------------------------------------------
def _fast_kernel(x_ref, w_ref, o_ref):
    # Whole (padded) K and N fit in one block; weight block index never changes
    # so the weight is DMAed into VMEM exactly once for the whole grid.
    o_ref[...] = jnp.dot(
        x_ref[...], w_ref[...], preferred_element_type=jnp.float32
    ).astype(o_ref.dtype)


def _tiled_kernel_f32(x_ref, w_ref, o_ref):
    # f32 output: accumulate directly into the K-resident output block
    # (saves the tm*tn*4 B scratch and a VMEM->VMEM copy per (i, j) tile).
    @pl.when(pl.program_id(2) == 0)
    def _():
        o_ref[...] = jnp.zeros_like(o_ref)

    o_ref[...] += jnp.dot(
        x_ref[...], w_ref[...], preferred_element_type=jnp.float32
    )


def _tiled_kernel_acc(x_ref, w_ref, o_ref, acc_ref):
    @pl.when(pl.program_id(2) == 0)
    def _():
        acc_ref[...] = jnp.zeros_like(acc_ref)

    acc_ref[...] += jnp.dot(
        x_ref[...], w_ref[...], preferred_element_type=jnp.float32
    )

    @pl.when(pl.program_id(2) == pl.num_programs(2) - 1)
    def _():
        o_ref[...] = acc_ref[...].astype(o_ref.dtype)


# ---------------------------------------------------------------------------
# Wrapper
# ---------------------------------------------------------------------------
@functools.partial(jax.jit, static_argnames=("force_tiled",))
def one_size_conv(x, weight, force_tiled=False):
    """x: (..., input_size); weight: (output_size, input_size) -> (..., output_size)."""
    n_out, k_in = weight.shape
    lead = x.shape[:-1]
    m = math.prod(lead) if lead else 1
    out_dtype = x.dtype

    if m == 0 or n_out == 0:
        return jnp.zeros((*lead, n_out), dtype=out_dtype)

    x2d = x.reshape(m, k_in)
    # One-time (K, N) relayout of the (small, reused) weight -> kernel runs the
    # standard MXU contraction with no per-step transpose of the weight tile.
    w_t = weight.T

    m_align = _sublane_min(x.dtype)
    kp_min = _round_up(max(k_in, 1), 128)
    np_min = _round_up(max(n_out, 1), 128)

    x_isz = jnp.dtype(x.dtype).itemsize
    w_isz = jnp.dtype(weight.dtype).itemsize
    o_isz = jnp.dtype(out_dtype).itemsize

    vmem_limit = _vmem_limit_bytes()
    vmem_budget = vmem_limit - (8 << 20)  # headroom for compiler scratch

    def _pad2d(a, rows, cols):
        r, c = a.shape
        if (rows, cols) == (r, c):
            return a
        return jnp.pad(a, ((0, rows - r), (0, cols - c)))

    w_res_bytes = kp_min * np_min * w_isz
    use_fast = (not force_tiled) and w_res_bytes <= 24 * 1024 * 1024

    if use_fast:
        tm = _pick_tile(m, 1024, m_align)

        def _fast_bytes(t):
            return w_res_bytes + 2 * t * kp_min * x_isz + 2 * t * np_min * o_isz

        while _fast_bytes(tm) > vmem_budget and tm > m_align:
            tm = _round_up(tm // 2, m_align)
        use_fast = _fast_bytes(tm) <= vmem_budget

    if use_fast:
        mp = _round_up(m, tm)
        # Guarantee >= 2 parallel M tiles so both v7x TensorCores get work.
        if mp // tm < 2 and m >= 2 * m_align:
            tm = _round_up(-(-m // 2), m_align)
            mp = _round_up(m, tm)

        xpad = _pad2d(x2d, mp, kp_min)
        wpad = _pad2d(w_t, kp_min, np_min)

        out2d = pl.pallas_call(
            _fast_kernel,
            out_shape=jax.ShapeDtypeStruct((mp, np_min), out_dtype),
            grid_spec=pltpu.PrefetchScalarGridSpec(
                num_scalar_prefetch=0,
                grid=(mp // tm,),
                in_specs=[
                    pl.BlockSpec((tm, kp_min), lambda i: (i, 0)),       # x tile
                    pl.BlockSpec((kp_min, np_min), lambda i: (0, 0)),   # resident W
                ],
                out_specs=pl.BlockSpec((tm, np_min), lambda i: (i, 0)),
            ),
            compiler_params=pltpu.CompilerParams(
                dimension_semantics=("parallel",),
                vmem_limit_bytes=vmem_limit,
            ),
        )(xpad, wpad)
    else:
        tm = _pick_tile(m, 1024, m_align)
        tn = _pick_tile(n_out, 1024, 128)
        tk = _pick_tile(k_in, 1024, 128)
        out_is_f32 = jnp.dtype(out_dtype) == jnp.dtype(jnp.float32)

        def _tiled_bytes(tm_, tn_, tk_):
            xb = 2 * tm_ * tk_ * x_isz
            wb = 2 * tk_ * tn_ * w_isz
            ob = 2 * tm_ * tn_ * o_isz
            ab = 0 if out_is_f32 else tm_ * tn_ * 4
            return xb + wb + ob + ab

        # Shrink (tk first, then tn, then tm) until the double-buffered working
        # set fits the chip's VMEM budget.  With 1024 targets this is a no-op
        # on every generation, but keeps us safe on v7x's 64 MiB.
        while _tiled_bytes(tm, tn, tk) > vmem_budget and tk > 128:
            tk = _round_up(tk // 2, 128)
        while _tiled_bytes(tm, tn, tk) > vmem_budget and tn > 128:
            tn = _round_up(tn // 2, 128)
        while _tiled_bytes(tm, tn, tk) > vmem_budget and tm > m_align:
            tm = _round_up(tm // 2, m_align)

        mp = _round_up(m, tm)
        np_ = _round_up(n_out, tn)
        kp = _round_up(k_in, tk)

        # Guarantee >= 2 parallel (i, j) tiles for the 2-TC v7x parts.
        if (mp // tm) * (np_ // tn) < 2 and m >= 2 * m_align:
            tm = _round_up(-(-m // 2), m_align)
            mp = _round_up(m, tm)

        xpad = _pad2d(x2d, mp, kp)
        wpad = _pad2d(w_t, kp, np_)

        grid = (mp // tm, np_ // tn, kp // tk)

        if out_is_f32:
            kernel = _tiled_kernel_f32
            scratch = []
        else:
            kernel = _tiled_kernel_acc
            scratch = [pltpu.VMEM((tm, tn), jnp.float32)]

        out2d = pl.pallas_call(
            kernel,
            out_shape=jax.ShapeDtypeStruct((mp, np_), out_dtype),
            grid_spec=pltpu.PrefetchScalarGridSpec(
                num_scalar_prefetch=0,
                grid=grid,
                in_specs=[
                    pl.BlockSpec((tm, tk), lambda i, j, k: (i, k)),   # x tile
                    pl.BlockSpec((tk, tn), lambda i, j, k: (k, j)),   # W.T tile
                ],
                out_specs=pl.BlockSpec((tm, tn), lambda i, j, k: (i, j)),
                scratch_shapes=scratch,
            ),
            compiler_params=pltpu.CompilerParams(
                dimension_semantics=("parallel", "parallel", "arbitrary"),
                vmem_limit_bytes=vmem_limit,
            ),
        )(xpad, wpad)

    if out2d.shape != (m, n_out):
        out2d = out2d[:m, :n_out]
    return out2d.reshape(*lead, n_out)


if __name__ == "__main__":
    # Shapes implied by the module: x = (..., input_size).  Small demo shapes.
    batch, seq = 2, 8
    input_size, output_size = 32, 64

    key = jax.random.PRNGKey(0)
    kx, kw = jax.random.split(key)

    # Deterministic weight matching nn.Linear's U(-1/sqrt(in), 1/sqrt(in)) range.
    bound = 1.0 / float(input_size) ** 0.5
    weight = jax.random.uniform(
        kw, (output_size, input_size), jnp.float32, minval=-bound, maxval=bound
    )
    x = jax.random.normal(kx, (batch, seq, input_size), jnp.float32)

    ref = x @ weight.T

    # Fast (resident-weight) path.
    out = jax.block_until_ready(one_size_conv(x, weight))
    assert out.shape == (batch, seq, output_size), out.shape
    assert jnp.allclose(out, ref, atol=1e-5, rtol=1e-5), float(
        jnp.max(jnp.abs(out - ref))
    )

    # Also exercise the general tiled (K-loop) path at the same small shapes.
    out_t = jax.block_until_ready(one_size_conv(x, weight, force_tiled=True))
    assert jnp.allclose(out_t, ref, atol=1e-5, rtol=1e-5), float(
        jnp.max(jnp.abs(out_t - ref))
    )

    # TODO(synk): `inverse` (torch.pinverse of W.T) is an SVD-based op with no
    # Pallas equivalent; only the forward pass is implemented.
    print("KERNEL_OK")
</pallas_src>

<mosaic_0001>
module attributes {stable_mosaic.version = 11 : i64} {
  func.func @_fast_kernel(%arg0: i32, %arg1: memref<8x128xf32, #tpu.memory_space<vmem>>, %arg2: memref<128x128xf32, #tpu.memory_space<vmem>>, %arg3: memref<8x128xf32, #tpu.memory_space<vmem>>) attributes {dimension_semantics = [#tpu.dimension_semantics<parallel>], iteration_bounds = array<i64: 2>, scalar_prefetch = 0 : i64, scratch_operands = 0 : i64, tpu.core_type = #tpu.core_type<tc>, window_params = [{transform_indices = @transform_0, window_bounds = array<i64: 8, 128>}, {pipeline_mode = #tpu.pipeline_mode<synchronous>, transform_indices = @transform_1, window_bounds = array<i64: 128, 128>}, {transform_indices = @transform_2, window_bounds = array<i64: 8, 128>}]} {
    %c0 = arith.constant 0 : index
    %c0_0 = arith.constant 0 : index
    %0 = vector.load %arg1[%c0, %c0_0] : memref<8x128xf32, #tpu.memory_space<vmem>>, vector<8x128xf32>
    %c0_1 = arith.constant 0 : index
    %c0_2 = arith.constant 0 : index
    %1 = vector.load %arg2[%c0_1, %c0_2] : memref<128x128xf32, #tpu.memory_space<vmem>>, vector<128x128xf32>
    %cst = arith.constant dense<0.000000e+00> : vector<8x128xf32>
    %2 = tpu.matmul %0, %1, %cst {dimension_numbers = #tpu.dot_dimension_numbers<[1], [0], [0], [1], [0, 0, 1, 1], [], []>} : vector<8x128xf32>, vector<128x128xf32>, vector<8x128xf32> -> vector<8x128xf32>
    %c0_3 = arith.constant 0 : index
    %c0_4 = arith.constant 0 : index
    %3 = vector.load %arg3[%c0_3, %c0_4] : memref<8x128xf32, #tpu.memory_space<vmem>>, vector<8x128xf32>
    tpu.vector_store %arg3[%c0_3, %c0_4], %2 {strides = array<i32>} : memref<8x128xf32, #tpu.memory_space<vmem>>, vector<8x128xf32>,
    return
  }
  func.func @transform_0(%arg0: i32) -> (i32, i32) {
    %c0_i32 = arith.constant 0 : i32
    %c0_i32_0 = arith.constant 0 : i32
    return %arg0, %c0_i32 : i32, i32
  }
  func.func @transform_1(%arg0: i32) -> (i32, i32) {
    %c0_i32 = arith.constant 0 : i32
    %c0_i32_0 = arith.constant 0 : i32
    %c0_i32_1 = arith.constant 0 : i32
    return %c0_i32, %c0_i32_0 : i32, i32
  }
  func.func @transform_2(%arg0: i32) -> (i32, i32) {
    %c0_i32 = arith.constant 0 : i32
    %c0_i32_0 = arith.constant 0 : i32
    return %arg0, %c0_i32 : i32, i32
  }
}

</mosaic_0001>

<bundles_post_ra>
// kernel: one_size_conv.1
= control target key start
LH: loop header
LB: loop body
LE: loop exit
PB: predicated region body
PF: predicated region fallthrough
CT: control target
= control target key end

     0   :  { %s376_s9 = smov 0   ;;  %s445_s0 = inlined_call_operand.vmem [shape: f32[16,128], index: 0, kind: input, shape index: {}]   ;;  %s446_s1 = inlined_call_operand.vmem [shape: f32[128,128], index: 1, kind: input, shape index: {}]   ;;  %s447_s2 = inlined_call_operand.vmem [shape: f32[16,128], index: 2, kind: output, shape index: {}]  }
   0x1 LB: > { %s280_s10 = sadd.s32 4294967295, %s357_s9   ;;  %p284_p0 = scmp.ge.s32.totalorder %s357_s9, 1  ;;  %s357_s9 = sphi %s376_s9, %s12_s9  }
   0x2   : > { %p111_p1 = scmp.lt.s32.totalorder %s357_s9, 3 }
   0x4   : > { %p112_p2 = pnand %p284_p0, %p111_p1 }
   0x5   : > { %p131_p3 = scmp.lt.s32.totalorder (!%p112_p2), %s280_s10, 1 }
   0x6   : > { %115 = sbr.rel (%p112_p2) target bundleno = 239 (0xef), region = 28 }
   0xb   : > { %v155_v0 = vld [vmem:[%s446_s1 + $0x78] sm:$0xff]  ;;  %v359_v1 = vmov 0.0   ;;  %v154_v2 = vld [vmem:[%s446_s1 + $0x70] sm:$0xff]  ;;  %vm360_vm0 = vmmov 0   ;;  %v153_v3 = vld [vmem:[%s446_s1 + $0x68] sm:$0xff]  ;;  %s449_s10 = smov (!%p131_p3, %s280_s10), 1 }
   0xc   : > { %306 = vmatprep.subr.mxu0 %v359_v1  ;;  %338 = vmatprep.mubr.msk.f32.mxu0 %vm360_vm0, %v359_v1  ;;  %v152_v4 = vld [vmem:[%s446_s1 + $0x60] sm:$0xff]  ;;  %v151_v5 = vld [vmem:[%s446_s1 + $0x58] sm:$0xff]  ;;  %v150_v6 = vld [vmem:[%s446_s1 + $0x50] sm:$0xff]  ;;  %s285_s11 = sshll.u32 %s449_s10, 3 }
   0xd   : > { %307 = vmatpush3.msra.mxu0 %v155_v0  ;;  %v149_v7 = vld [vmem:[%s446_s1 + $0x48] sm:$0xff]  ;;  %v148_v8 = vld [vmem:[%s446_s1 + $0x40] sm:$0xff]  ;;  %v147_v9 = vld [vmem:[%s446_s1 + $0x38] sm:$0xff]  ;;  %s134_s18 = scalar_lea.vmem %s445_s0, %s285_s11  ;;  %s138_s22 = scalar_lea.vmem %s447_s2, %s285_s11 }
   0xe   : > { %308 = vmatprep.subr.mxu0 %v359_v1  ;;  %v146_v10 = vld [vmem:[%s446_s1 + $0x30] sm:$0xff]  ;;  %v145_v11 = vld [vmem:[%s446_s1 + $0x28] sm:$0xff]  ;;  %v144_v12 = vld [vmem:[%s446_s1 + $0x20] sm:$0xff] }
   0xf   : > { %309 = vmatpush3.msra.mxu0 %v154_v2  ;;  %v143_v13 = vld [vmem:[%s446_s1 + $0x18] sm:$0xff]  ;;  %v142_v14 = vld [vmem:[%s446_s1 + $0x10] sm:$0xff]  ;;  %v141_v15 = vld [vmem:[%s446_s1 + $0x8] sm:$0xff] }
  0x10   : > { %310 = vmatprep.subr.mxu0 %v359_v1  ;;  %v140_v16 = vld [vmem:[%s446_s1] sm:$0xff] }
  0x11   : > { %311 = vmatpush3.msra.mxu0 %v153_v3  ;;  %v139_v17 = vld [vmem:[%s134_s18] sm:$0xff] }
  0x12   : > { %312 = vmatprep.subr.mxu0 %v359_v1 }
  0x13   : > { %313 = vmatpush3.msra.mxu0 %v152_v4 }
  0x14   : > { %314 = vmatprep.subr.mxu0 %v359_v1 }
  0x15   : > { %315 = vmatpush3.msra.mxu0 %v151_v5 }
  0x16   : > { %316 = vmatprep.subr.mxu0 %v359_v1 }
  0x17   : > { %317 = vmatpush3.msra.mxu0 %v150_v6 }
  0x18   : > { %318 = vmatprep.subr.mxu0 %v359_v1 }
  0x19   : > { %319 = vmatpush3.msra.mxu0 %v149_v7 }
  0x1a   : > { %320 = vmatprep.subr.mxu0 %v359_v1 }
  0x1b   : > { %321 = vmatpush3.msra.mxu0 %v148_v8 }
  0x1c   : > { %322 = vmatprep.subr.mxu0 %v359_v1 }
  0x1d   : > { %323 = vmatpush3.msra.mxu0 %v147_v9 }
  0x1e   : > { %324 = vmatprep.subr.mxu0 %v359_v1 }
  0x1f   : > { %325 = vmatpush3.msra.mxu0 %v146_v10 }
  0x20   : > { %326 = vmatprep.subr.mxu0 %v359_v1 }
  0x21   : > { %327 = vmatpush3.msra.mxu0 %v145_v11 }
  0x22   : > { %328 = vmatprep.subr.mxu0 %v359_v1 }
  0x23   : > { %329 = vmatpush3.msra.mxu0 %v144_v12 }
  0x24   : > { %330 = vmatprep.subr.mxu0 %v359_v1 }
  0x25   : > { %331 = vmatpush3.msra.mxu0 %v143_v13 }
  0x26   : > { %332 = vmatprep.subr.mxu0 %v359_v1 }
  0x27   : > { %333 = vmatpush3.msra.mxu0 %v142_v14 }
  0x28   : > { %334 = vmatprep.subr.mxu0 %v359_v1 }
  0x29   : > { %335 = vmatpush3.msra.mxu0 %v141_v15 }
  0x2a   : > { %336 = vmatprep.subr.mxu0 %v359_v1 }
  0x2b   : > { %337 = vmatpush3.msra.mxu0 %v140_v16 }
  0x2c   : > { %339 = vmatmul.mubr.f32.vlgmr.msra.gmra.mxu0 %v139_v17 }
  0xec   : > { %v222_v18 = vpop.f32.mrf.mxu0 }
  0xed   : > { %226 = vst [vmem:[%s138_s22] sm:$0xff] %v222_v18 }
  0xee   : > { %v340_v19 = vpop.f32.mrf.mxu0 }
  0xef PF: > { %s12_s9 = sadd.s32 1, %s357_s9  }
  0xf0   : > { %p9_p4 = scmp.ge.s32.totalorder %s12_s9, 4  }
  0xf2   :  { %11 = sbr.rel (!%p9_p4) target bundleno = 1 (0x1), region = 58 }

</bundles_post_ra>
